<compile_context>
chip_gen: v5e
topology: v5e:2x2
jax: 0.10.0
libtpu: 0.0.40
codegen_flags: <defaults>
</compile_context>

<pallas_src>
import jax
import jax.numpy as jnp
from jax import lax
from jax.experimental import pallas as pl
from jax.experimental.pallas import tpu as pltpu

BN_EPS = 1e-5
BN_MOMENTUM = 0.1  # TODO(synk): running_mean/var momentum update is a training-time
                   # buffer mutation with no effect on the forward output; not implemented.


def _round_up(x, m):
    return (x + m - 1) // m * m


def _choose_tile_m(m, k, c_pad, budget_bytes=24 << 20):
    """Largest M-tile whose double-buffered working set fits the VMEM budget."""
    tm = 1024
    while tm > 8:
        vmem = 2 * (tm * k * 2)        # patches tile (bf16), double buffered
        vmem += 2 * (k * c_pad * 2)    # weight tile (bf16)
        vmem += 2 * (tm * c_pad * 4)   # f32 output tile (pass 2)
        vmem += 8 * (c_pad * 4)        # scale/shift/gamma/beta blocks + scratch
        if vmem <= budget_bytes:
            break
        tm //= 2
    m8 = max(8, _round_up(m, 8))
    tm = min(tm, m8)
    if tm == m8 and m8 >= 16:
        # Split into (at least) two tiles so the pipeline overlaps DMA & compute.
        tm = max(8, _round_up(m8 // 2, 8))
    return tm


# ---------------- Pallas kernels ----------------

def _make_stats_kernel(inv_m):
    """Pass 1: conv tile on MXU + per-channel sum / sum-of-squares accumulation,
    with the BN finalize (scale/shift fold) fused into the last grid step."""

    def kernel(p_ref, w_ref, gamma_ref, beta_ref, scale_ref, shift_ref,
               sum_sc, sq_sc):
        i = pl.program_id(0)

        @pl.when(i == 0)
        def _():
            sum_sc[...] = jnp.zeros_like(sum_sc)
            sq_sc[...] = jnp.zeros_like(sq_sc)

        conv = jnp.dot(p_ref[...], w_ref[...], preferred_element_type=jnp.float32)
        sum_sc[...] += jnp.sum(conv, axis=0, keepdims=True)
        sq_sc[...] += jnp.sum(conv * conv, axis=0, keepdims=True)

        @pl.when(i == pl.num_programs(0) - 1)
        def _():
            mean = sum_sc[...] * inv_m
            var = jnp.maximum(sq_sc[...] * inv_m - mean * mean, 0.0)  # biased var
            inv_std = lax.rsqrt(var + BN_EPS)
            scale = gamma_ref[...] * inv_std
            scale_ref[...] = scale
            shift_ref[...] = beta_ref[...] - mean * scale

    return kernel


def _conv_bn_relu_kernel(p_ref, w_ref, scale_ref, shift_ref, out_ref):
    """Pass 2: conv tile on MXU + fused BN scale/shift + ReLU."""
    conv = jnp.dot(p_ref[...], w_ref[...], preferred_element_type=jnp.float32)
    y = conv * scale_ref[...] + shift_ref[...]
    out_ref[...] = jnp.maximum(y, 0.0).astype(out_ref.dtype)


# ---------------- wrapper ----------------

def relu_conv_bn(x_nchw, weight, gamma, beta, *, stride, padding):
    """Forward of ReLUConvBN. weight: (C_out, C_in, KH, KW) as in PyTorch."""
    C_out, C_in, KH, KW = weight.shape
    N, C, H, W = x_nchw.shape
    assert C == C_in

    # ---- glue: NCHW -> NHWC, pad, im2col (bf16 MXU operands) ----
    # TODO(synk): im2col materializes a KH*KW-inflated activation in HBM; a fully
    # fused variant would gather (kh, kw) shifted windows in-kernel instead.
    x = jnp.transpose(x_nchw, (0, 2, 3, 1)).astype(jnp.float32)
    x = jnp.pad(x, ((0, 0), (padding, padding), (padding, padding), (0, 0)))
    H_out = (H + 2 * padding - KH) // stride + 1
    W_out = (W + 2 * padding - KW) // stride + 1
    cols = []
    for i in range(KH):
        for j in range(KW):
            cols.append(x[:, i:i + stride * H_out:stride,
                          j:j + stride * W_out:stride, :])
    patches = jnp.concatenate(cols, axis=-1).reshape(N * H_out * W_out,
                                                     KH * KW * C_in)

    M, K = patches.shape
    C_pad = _round_up(C_out, 128)                 # lane-dense output channels
    TM = _choose_tile_m(M, K, C_pad)
    M_pad = _round_up(M, TM)
    n_tiles = M_pad // TM

    patches = jnp.pad(patches, ((0, M_pad - M), (0, 0))).astype(jnp.bfloat16)

    # (C_out, C_in, KH, KW) -> (KH, KW, C_in, C_out) -> (K, C_out), matching patch order
    w_mat = jnp.transpose(weight, (2, 3, 1, 0)).reshape(K, C_out).astype(jnp.float32)
    w_mat = jnp.pad(w_mat, ((0, 0), (0, C_pad - C_out))).astype(jnp.bfloat16)

    gamma_p = jnp.pad(gamma.astype(jnp.float32), (0, C_pad - C_out)).reshape(1, C_pad)
    beta_p = jnp.pad(beta.astype(jnp.float32), (0, C_pad - C_out)).reshape(1, C_pad)

    flops_mm = 2 * M_pad * K * C_pad
    bytes_in = M_pad * K * 2 + K * C_pad * 2

    # ---- pass 1: conv tiles + per-channel stats -> folded scale/shift ----
    scale, shift = pl.pallas_call(
        _make_stats_kernel(1.0 / M),              # true M (padded rows are zero)
        out_shape=(jax.ShapeDtypeStruct((1, C_pad), jnp.float32),
                   jax.ShapeDtypeStruct((1, C_pad), jnp.float32)),
        grid=(n_tiles,),
        in_specs=[
            pl.BlockSpec((TM, K), lambda i: (i, 0)),
            pl.BlockSpec((K, C_pad), lambda i: (0, 0)),
            pl.BlockSpec((1, C_pad), lambda i: (0, 0)),
            pl.BlockSpec((1, C_pad), lambda i: (0, 0)),
        ],
        out_specs=(
            pl.BlockSpec((1, C_pad), lambda i: (0, 0)),
            pl.BlockSpec((1, C_pad), lambda i: (0, 0)),
        ),
        scratch_shapes=[pltpu.VMEM((1, C_pad), jnp.float32),
                        pltpu.VMEM((1, C_pad), jnp.float32)],
        compiler_params=pltpu.CompilerParams(
            dimension_semantics=("arbitrary",),   # sequential reduction over M tiles
            vmem_limit_bytes=32 << 20),
        cost_estimate=pl.CostEstimate(
            flops=int(flops_mm), transcendentals=int(C_pad),
            bytes_accessed=int(bytes_in + 4 * C_pad * 4)),
    )(patches, w_mat, gamma_p, beta_p)

    # ---- pass 2: matmul + fused scale/shift + ReLU (parallel over M tiles) ----
    out = pl.pallas_call(
        _conv_bn_relu_kernel,
        out_shape=jax.ShapeDtypeStruct((M_pad, C_pad), jnp.float32),
        grid=(n_tiles,),
        in_specs=[
            pl.BlockSpec((TM, K), lambda i: (i, 0)),
            pl.BlockSpec((K, C_pad), lambda i: (0, 0)),
            pl.BlockSpec((1, C_pad), lambda i: (0, 0)),
            pl.BlockSpec((1, C_pad), lambda i: (0, 0)),
        ],
        out_specs=pl.BlockSpec((TM, C_pad), lambda i: (i, 0)),
        compiler_params=pltpu.CompilerParams(
            dimension_semantics=("parallel",),    # independent tiles -> 2nd TC on v7x
            vmem_limit_bytes=32 << 20),
        cost_estimate=pl.CostEstimate(
            flops=int(flops_mm), transcendentals=0,
            bytes_accessed=int(bytes_in + M_pad * C_pad * 4)),
    )(patches, w_mat, scale, shift)

    y = out[:M, :C_out].reshape(N, H_out, W_out, C_out)
    return jnp.transpose(y, (0, 3, 1, 2))  # back to NCHW


# ---------------- reference (pure JAX) ----------------

def _reference(x_nchw, weight, gamma, beta, *, stride, padding, mxu_bf16=False):
    xw = x_nchw.astype(jnp.float32)
    ww = weight.astype(jnp.float32)
    if mxu_bf16:  # mimic the kernel's bf16 MXU operands (f32 accumulation)
        xw = xw.astype(jnp.bfloat16).astype(jnp.float32)
        ww = ww.astype(jnp.bfloat16).astype(jnp.float32)
    conv = lax.conv_general_dilated(
        xw, ww, window_strides=(stride, stride),
        padding=[(padding, padding), (padding, padding)],
        dimension_numbers=("NCHW", "OIHW", "NCHW"))
    mean = conv.mean(axis=(0, 2, 3), keepdims=True)
    var = conv.var(axis=(0, 2, 3), keepdims=True)  # biased, as BN uses for normalization
    y = (conv - mean) * lax.rsqrt(var + BN_EPS)
    y = y * gamma.reshape(1, -1, 1, 1) + beta.reshape(1, -1, 1, 1)
    return jnp.maximum(y, 0.0)


if __name__ == "__main__":
    # Small shapes consistent with the module's forward.
    N, C_in, H, W = 2, 4, 16, 16
    C_out, KH, KW = 8, 3, 3
    stride, padding = 1, 1

    key = jax.random.PRNGKey(0)
    kx, kw, kg, kb = jax.random.split(key, 4)
    x = jax.random.normal(kx, (N, C_in, H, W), dtype=jnp.float32)
    weight = 0.1 * jax.random.normal(kw, (C_out, C_in, KH, KW), dtype=jnp.float32)
    gamma = 1.0 + 0.1 * jax.random.normal(kg, (C_out,), dtype=jnp.float32)  # affine=True
    beta = 0.1 * jax.random.normal(kb, (C_out,), dtype=jnp.float32)

    out = relu_conv_bn(x, weight, gamma, beta, stride=stride, padding=padding)
    out = jax.block_until_ready(out)
    assert out.shape == (N, C_out, H, W), out.shape

    # Tight check vs a reference with matched bf16 MXU operands (kernel math).
    ref_bf16 = _reference(x, weight, gamma, beta, stride=stride, padding=padding,
                          mxu_bf16=True)
    err_bf16 = float(jnp.abs(out - ref_bf16).max())
    assert jnp.allclose(out, ref_bf16, atol=2e-3, rtol=2e-3), err_bf16

    # Loose check vs the full-f32 module semantics (bf16 operand rounding only).
    ref_f32 = _reference(x, weight, gamma, beta, stride=stride, padding=padding)
    err_f32 = float(jnp.abs(out - ref_f32).max())
    assert jnp.allclose(out, ref_f32, atol=5e-2, rtol=5e-2), err_f32

    print("KERNEL_OK")
</pallas_src>

<mosaic_0001>
module attributes {stable_mosaic.version = 11 : i64} {
  func.func @kernel(%arg0: i32, %arg1: memref<256x36xbf16, #tpu.memory_space<vmem>>, %arg2: memref<36x128xbf16, #tpu.memory_space<vmem>>, %arg3: memref<1x128xf32, #tpu.memory_space<vmem>>, %arg4: memref<1x128xf32, #tpu.memory_space<vmem>>, %arg5: memref<1x128xf32, #tpu.memory_space<vmem>>, %arg6: memref<1x128xf32, #tpu.memory_space<vmem>>, %arg7: memref<1x128xf32, #tpu.memory_space<vmem>>, %arg8: memref<1x128xf32, #tpu.memory_space<vmem>>) attributes {dimension_semantics = [#tpu.dimension_semantics<arbitrary>], iteration_bounds = array<i64: 2>, scalar_prefetch = 0 : i64, scratch_operands = 2 : i64, tpu.core_type = #tpu.core_type<tc>, window_params = [{transform_indices = @transform_0, window_bounds = array<i64: 256, 36>}, {pipeline_mode = #tpu.pipeline_mode<synchronous>, transform_indices = @transform_1, window_bounds = array<i64: 36, 128>}, {pipeline_mode = #tpu.pipeline_mode<synchronous>, transform_indices = @transform_2, window_bounds = array<i64: 1, 128>}, {pipeline_mode = #tpu.pipeline_mode<synchronous>, transform_indices = @transform_3, window_bounds = array<i64: 1, 128>}, {pipeline_mode = #tpu.pipeline_mode<synchronous>, transform_indices = @transform_4, window_bounds = array<i64: 1, 128>}, {pipeline_mode = #tpu.pipeline_mode<synchronous>, transform_indices = @transform_5, window_bounds = array<i64: 1, 128>}]} {
    %c0_i32 = arith.constant 0 : i32
    %0 = arith.cmpi eq, %arg0, %c0_i32 : i32
    %1 = arith.extui %0 : i1 to i32
    %c0_i32_0 = arith.constant 0 : i32
    %2 = arith.cmpi ne, %1, %c0_i32_0 : i32
    scf.if %2 {
      %cst_15 = arith.constant 0.000000e+00 : f32
      %20 = vector.broadcast %cst_15 : f32 to vector<1x128xf32>
      %c0_16 = arith.constant 0 : index
      %c0_17 = arith.constant 0 : index
      %21 = vector.load %arg7[%c0_16, %c0_17] : memref<1x128xf32, #tpu.memory_space<vmem>>, vector<1x128xf32>
      tpu.vector_store %arg7[%c0_16, %c0_17], %20 {strides = array<i32>} : memref<1x128xf32, #tpu.memory_space<vmem>>, vector<1x128xf32>,
      %cst_18 = arith.constant 0.000000e+00 : f32
      %22 = vector.broadcast %cst_18 : f32 to vector<1x128xf32>
      %c0_19 = arith.constant 0 : index
      %c0_20 = arith.constant 0 : index
      %23 = vector.load %arg8[%c0_19, %c0_20] : memref<1x128xf32, #tpu.memory_space<vmem>>, vector<1x128xf32>
      tpu.vector_store %arg8[%c0_19, %c0_20], %22 {strides = array<i32>} : memref<1x128xf32, #tpu.memory_space<vmem>>, vector<1x128xf32>,
    } else {
    }
    %c0 = arith.constant 0 : index
    %c0_1 = arith.constant 0 : index
    %3 = vector.load %arg1[%c0, %c0_1] : memref<256x36xbf16, #tpu.memory_space<vmem>>, vector<256x36xbf16>
    %c0_2 = arith.constant 0 : index
    %c0_3 = arith.constant 0 : index
    %4 = vector.load %arg2[%c0_2, %c0_3] : memref<36x128xbf16, #tpu.memory_space<vmem>>, vector<36x128xbf16>
    %cst = arith.constant dense<0.000000e+00> : vector<256x128xf32>
    %5 = tpu.matmul %3, %4, %cst {dimension_numbers = #tpu.dot_dimension_numbers<[1], [0], [0], [1], [0, 0, 1, 1], [], []>} : vector<256x36xbf16>, vector<36x128xbf16>, vector<256x128xf32> -> vector<256x128xf32>
    %c0_4 = arith.constant 0 : index
    %c0_5 = arith.constant 0 : index
    %6 = vector.load %arg7[%c0_4, %c0_5] : memref<1x128xf32, #tpu.memory_space<vmem>>, vector<1x128xf32>
    %cst_6 = arith.constant dense<0.000000e+00> : vector<128xf32>
    %7 = vector.multi_reduction <add>, %5, %cst_6 [0] : vector<256x128xf32> to vector<128xf32>
    %8 = vector.shape_cast %7 : vector<128xf32> to vector<1x128xf32>
    %9 = arith.addf %6, %8 : vector<1x128xf32>
    %c0_7 = arith.constant 0 : index
    %c0_8 = arith.constant 0 : index
    %10 = vector.load %arg7[%c0_7, %c0_8] : memref<1x128xf32, #tpu.memory_space<vmem>>, vector<1x128xf32>
    tpu.vector_store %arg7[%c0_7, %c0_8], %9 {strides = array<i32>} : memref<1x128xf32, #tpu.memory_space<vmem>>, vector<1x128xf32>,
    %c0_9 = arith.constant 0 : index
    %c0_10 = arith.constant 0 : index
    %11 = vector.load %arg8[%c0_9, %c0_10] : memref<1x128xf32, #tpu.memory_space<vmem>>, vector<1x128xf32>
    %12 = arith.mulf %5, %5 : vector<256x128xf32>
    %cst_11 = arith.constant dense<0.000000e+00> : vector<128xf32>
    %13 = vector.multi_reduction <add>, %12, %cst_11 [0] : vector<256x128xf32> to vector<128xf32>
    %14 = vector.shape_cast %13 : vector<128xf32> to vector<1x128xf32>
    %15 = arith.addf %11, %14 : vector<1x128xf32>
    %c0_12 = arith.constant 0 : index
    %c0_13 = arith.constant 0 : index
    %16 = vector.load %arg8[%c0_12, %c0_13] : memref<1x128xf32, #tpu.memory_space<vmem>>, vector<1x128xf32>
    tpu.vector_store %arg8[%c0_12, %c0_13], %15 {strides = array<i32>} : memref<1x128xf32, #tpu.memory_space<vmem>>, vector<1x128xf32>,
    %c1_i32 = arith.constant 1 : i32
    %17 = arith.cmpi eq, %arg0, %c1_i32 : i32
    %18 = arith.extui %17 : i1 to i32
    %c0_i32_14 = arith.constant 0 : i32
    %19 = arith.cmpi ne, %18, %c0_i32_14 : i32
    scf.if %19 {
      %c0_15 = arith.constant 0 : index
      %c0_16 = arith.constant 0 : index
      %20 = vector.load %arg7[%c0_15, %c0_16] : memref<1x128xf32, #tpu.memory_space<vmem>>, vector<1x128xf32>
      %cst_17 = arith.constant 0.001953125 : f32
      %21 = vector.broadcast %cst_17 : f32 to vector<1x128xf32>
      %22 = arith.mulf %20, %21 : vector<1x128xf32>
      %c0_18 = arith.constant 0 : index
      %c0_19 = arith.constant 0 : index
      %23 = vector.load %arg8[%c0_18, %c0_19] : memref<1x128xf32, #tpu.memory_space<vmem>>, vector<1x128xf32>
      %cst_20 = arith.constant 0.001953125 : f32
      %24 = vector.broadcast %cst_20 : f32 to vector<1x128xf32>
      %25 = arith.mulf %23, %24 : vector<1x128xf32>
      %26 = arith.mulf %22, %22 : vector<1x128xf32>
      %27 = arith.subf %25, %26 : vector<1x128xf32>
      %cst_21 = arith.constant 0.000000e+00 : f32
      %28 = vector.broadcast %cst_21 : f32 to vector<1x128xf32>
      %29 = arith.maximumf %27, %28 : vector<1x128xf32>
      %cst_22 = arith.constant 9.99999974E-6 : f32
      %30 = vector.broadcast %cst_22 : f32 to vector<1x128xf32>
      %31 = arith.addf %29, %30 : vector<1x128xf32>
      %32 = math.rsqrt %31 : vector<1x128xf32>
      %c0_23 = arith.constant 0 : index
      %c0_24 = arith.constant 0 : index
      %33 = vector.load %arg3[%c0_23, %c0_24] : memref<1x128xf32, #tpu.memory_space<vmem>>, vector<1x128xf32>
      %34 = arith.mulf %33, %32 : vector<1x128xf32>
      %c0_25 = arith.constant 0 : index
      %c0_26 = arith.constant 0 : index
      %35 = vector.load %arg5[%c0_25, %c0_26] : memref<1x128xf32, #tpu.memory_space<vmem>>, vector<1x128xf32>
      tpu.vector_store %arg5[%c0_25, %c0_26], %34 {strides = array<i32>} : memref<1x128xf32, #tpu.memory_space<vmem>>, vector<1x128xf32>,
      %c0_27 = arith.constant 0 : index
      %c0_28 = arith.constant 0 : index
      %36 = vector.load %arg4[%c0_27, %c0_28] : memref<1x128xf32, #tpu.memory_space<vmem>>, vector<1x128xf32>
      %37 = arith.mulf %22, %34 : vector<1x128xf32>
      %38 = arith.subf %36, %37 : vector<1x128xf32>
      %c0_29 = arith.constant 0 : index
      %c0_30 = arith.constant 0 : index
      %39 = vector.load %arg6[%c0_29, %c0_30] : memref<1x128xf32, #tpu.memory_space<vmem>>, vector<1x128xf32>
      tpu.vector_store %arg6[%c0_29, %c0_30], %38 {strides = array<i32>} : memref<1x128xf32, #tpu.memory_space<vmem>>, vector<1x128xf32>,
    } else {
    }
    return
  }
  func.func @transform_0(%arg0: i32) -> (i32, i32) {
    %c0_i32 = arith.constant 0 : i32
    %c0_i32_0 = arith.constant 0 : i32
    return %arg0, %c0_i32 : i32, i32
  }
  func.func @transform_1(%arg0: i32) -> (i32, i32) {
    %c0_i32 = arith.constant 0 : i32
    %c0_i32_0 = arith.constant 0 : i32
    %c0_i32_1 = arith.constant 0 : i32
    return %c0_i32, %c0_i32_0 : i32, i32
  }
  func.func @transform_2(%arg0: i32) -> (i32, i32) {
    %c0_i32 = arith.constant 0 : i32
    %c0_i32_0 = arith.constant 0 : i32
    %c0_i32_1 = arith.constant 0 : i32
    return %c0_i32, %c0_i32_0 : i32, i32
  }
  func.func @transform_3(%arg0: i32) -> (i32, i32) {
    %c0_i32 = arith.constant 0 : i32
    %c0_i32_0 = arith.constant 0 : i32
    %c0_i32_1 = arith.constant 0 : i32
    return %c0_i32, %c0_i32_0 : i32, i32
  }
  func.func @transform_4(%arg0: i32) -> (i32, i32) {
    %c0_i32 = arith.constant 0 : i32
    %c0_i32_0 = arith.constant 0 : i32
    %c0_i32_1 = arith.constant 0 : i32
    return %c0_i32, %c0_i32_0 : i32, i32
  }
  func.func @transform_5(%arg0: i32) -> (i32, i32) {
    %c0_i32 = arith.constant 0 : i32
    %c0_i32_0 = arith.constant 0 : i32
    %c0_i32_1 = arith.constant 0 : i32
    return %c0_i32, %c0_i32_0 : i32, i32
  }
}

</mosaic_0001>

<bundles_post_ra>
// kernel: tpu_custom_call.1
= control target key start
LH: loop header
LB: loop body
LE: loop exit
PB: predicated region body
PF: predicated region fallthrough
CT: control target
= control target key end

     0   :  { %11 = vsyncpa [#allocation5], 0  ;;  %s1087_s0 = inlined_call_operand.vmem [shape: bf16[512,36], index: 0, kind: input, shape index: {}]   ;;  %s1088_s1 = inlined_call_operand.vmem [shape: bf16[36,128], index: 1, kind: input, shape index: {}]   ;;  %s1089_s2 = inlined_call_operand.vmem [shape: f32[1,128], index: 2, kind: input, shape index: {}]   ;;  %s1090_s3 = inlined_call_operand.vmem [shape: f32[1,128], index: 3, kind: input, shape index: {}]   ;;  %s1091_s4 = inlined_call_operand.hbm [shape: f32[1,128], index: 4, kind: output, shape index: {0}]   ;;  %s1092_s5 = inlined_call_operand.hbm [shape: f32[1,128], index: 5, kind: output, shape index: {1}]  }
   0x1   :  { %12 = vsyncpa [#allocation7], 0  ;;  %s965_s18 = smov 0  }
   0x2 LB: > { %s971_s19 = sadd.s32 4294967295, %s930_s18   ;;  %p709_p0 = scmp.ge.s32.totalorder %s930_s18, 1  ;;  %s930_s18 = sphi %s965_s18, %s18_s18  }
   0x3   : > { %p183_p1 = scmp.lt.s32.totalorder %s930_s18, 3 }
   0x5   : > { %p184_p2 = pnand %p709_p0, %p183_p1 }
   0x6   : > { %s710_s20 = sshll.u32 (!%p184_p2), %s971_s19, 5  ;;  %p712_p4 = scmp.ne.s32.totalorder (!%p184_p2), %s971_s19, 0 }
   0x7   : > { %187 = sbr.rel (%p184_p2) target bundleno = 336 (0x150), region = 36  ;;  %p207_p3 = scmp.lt.s32.totalorder (!%p184_p2), %s710_s20, 63 }
   0xc   : > { %s1094_s20 = smov (!%p207_p3, %s710_s20), 63  ;;  %216 = sbr.rel (%p712_p4) target bundleno = 20 (0x14), region = 40 }
   0xd   : > { %s711_s21 = sshll.u32 %s1094_s20, 2 }
   0xe   : > { %s979_s24 = scalar_lea.vmem %s1087_s0, %s711_s21 }
  0x11   : > { %v932_v0 = vmov 0.0  }
  0x12   : > { %217 = vst [vmem:[#allocation2] sm:$0x1] %v932_v0 }
  0x13   : > { %218 = vst [vmem:[#allocation3] sm:$0x1] %v932_v0 }
  0x14 PF: > { %v255_v1 = vld [vmem:[%s1088_s1 + $0x10] sm:$0x3]  ;;  %vm400_vm0 = vcmask 1041408   ;;  %v825_v5 = vld [vmem:[%s1088_s1 + $0x8] sm:$0xff]  ;;  %v824_v6 = vld [vmem:[%s1088_s1] sm:$0xff]  ;;  %vm351_vm1 = vcmask 293888  }
  0x15   : > { %v345_v2 = vunpack.c.l.b16 %v255_v1  ;;  %v808_v7 = vld [vmem:[%s979_s24] sm:$0xff]  ;;  %v809_v11 = vld [vmem:[%s979_s24 + $0x8] sm:$0xff]  ;;  %v810_v15 = vld [vmem:[%s979_s24 + $0x10] sm:$0xff]  ;;  %p801_p5 = scmp.ne.s32.totalorder %s971_s19, 1 }
  0x16   : > { %v812_v8 = vld [vmem:[%s979_s24 + $0x20] sm:$0xff]  ;;  %v813_v12 = vld [vmem:[%s979_s24 + $0x28] sm:$0xff]  ;;  %v814_v16 = vld [vmem:[%s979_s24 + $0x30] sm:$0xff] }
  0x17   : > { %v348_v3 = vpack.c.b16 %v345_v2, %v345_v2  ;;  %v816_v9 = vld [vmem:[%s979_s24 + $0x40] sm:$0xff]  ;;  %v817_v13 = vld [vmem:[%s979_s24 + $0x48] sm:$0xff]  ;;  %v818_v17 = vld [vmem:[%s979_s24 + $0x50] sm:$0xff] }
  0x18   : > { %v820_v10 = vld [vmem:[%s979_s24 + $0x60] sm:$0xff]  ;;  %v821_v14 = vld [vmem:[%s979_s24 + $0x68] sm:$0xff]  ;;  %v822_v18 = vld [vmem:[%s979_s24 + $0x70] sm:$0xff] }
  0x19   : > { %v402_v4 = vsel %vm400_vm0, %v348_v3, 0  ;;  %v811_v19 = vld [vmem:[%s979_s24 + $0x18] sm:$0xff] }
  0x1a   : > { %409 = vmatpush.bf16.msra.mxu0 %v402_v4  ;;  %826 = vmatpush.bf16.msra.mxu1 %v402_v4  ;;  %v815_v20 = vld [vmem:[%s979_s24 + $0x38] sm:$0xff] }
  0x1b   : > { %827 = vmatpush.bf16.msra.mxu2 %v402_v4  ;;  %828 = vmatpush.bf16.msra.mxu3 %v402_v4  ;;  %v819_v21 = vld [vmem:[%s979_s24 + $0x58] sm:$0xff] }
  0x1c   : > { %v823_v22 = vld [vmem:[%s979_s24 + $0x78] sm:$0xff] }
  0x1e   : > { %410 = vmatpush.bf16.msra.mxu0 %v825_v5  ;;  %829 = vmatpush.bf16.msra.mxu1 %v825_v5 }
  0x1f   : > { %830 = vmatpush.bf16.msra.mxu2 %v825_v5  ;;  %831 = vmatpush.bf16.msra.mxu3 %v825_v5 }
  0x22   : > { %411 = vmatpush.bf16.msra.mxu0 %v824_v6  ;;  %832 = vmatpush.bf16.msra.mxu1 %v824_v6 }
  0x23   : > { %833 = vmatpush.bf16.msra.mxu2 %v824_v6  ;;  %834 = vmatpush.bf16.msra.mxu3 %v824_v6 }
  0x25   : > { %785 = vmatmul.msk.bf16.vlgmr.msra.gmra.mxu0 %vm351_vm1, %v808_v7  ;;  %789 = vmatmul.msk.bf16.vlgmr.msra.gmra.mxu1 %vm351_vm1, %v812_v8 }
  0x26   : > { %793 = vmatmul.msk.bf16.vlgmr.msra.gmra.mxu2 %vm351_vm1, %v816_v9  ;;  %797 = vmatmul.msk.bf16.vlgmr.msra.gmra.mxu3 %vm351_vm1, %v820_v10 }
  0x35   : > { %786 = vmatmul.msk.bf16.gmra.mxu0 %vm351_vm1, %v809_v11  ;;  %790 = vmatmul.msk.bf16.gmra.mxu1 %vm351_vm1, %v813_v12 }
  0x36   : > { %794 = vmatmul.msk.bf16.gmra.mxu2 %vm351_vm1, %v817_v13  ;;  %798 = vmatmul.msk.bf16.gmra.mxu3 %vm351_vm1, %v821_v14 }
  0x45   : > { %787 = vmatmul.msk.bf16.gmra.mxu0 %vm351_vm1, %v810_v15  ;;  %791 = vmatmul.msk.bf16.gmra.mxu1 %vm351_vm1, %v814_v16 }
  0x46   : > { %795 = vmatmul.msk.bf16.gmra.mxu2 %vm351_vm1, %v818_v17  ;;  %799 = vmatmul.msk.bf16.gmra.mxu3 %vm351_vm1, %v822_v18 }
  0x55   : > { %788 = vmatmul.msk.bf16.gmra.mxu0 %vm351_vm1, %v811_v19  ;;  %792 = vmatmul.msk.bf16.gmra.mxu1 %vm351_vm1, %v815_v20 }
  0x56   : > { %796 = vmatmul.msk.bf16.gmra.mxu2 %vm351_vm1, %v819_v21  ;;  %800 = vmatmul.msk.bf16.gmra.mxu3 %vm351_vm1, %v823_v22 }
  0xa2   : > { %v413_v23 = vpop.f32.mrf.mxu0  ;;  %v433_v24 = vpop.f32.mrf.mxu1 }
  0xa3   : > { %v534_v40 = vmul.f32 %v413_v23, %v413_v23  ;;  %v542_v2 = vmul.f32 %v433_v24, %v433_v24 }
  0xa9   : > { %v1023_v28 = vpop.f32.mrf.mxu2  ;;  %v1027_v34 = vpop.f32.mrf.mxu3 }
  0xaa   : > { %v415_v25 = vpop.f32.mrf.mxu0  ;;  %v435_v26 = vpop.f32.mrf.mxu1 }
  0xab   : > { %v535_v39 = vmul.f32 %v415_v25, %v415_v25  ;;  %v494_v41 = vadd.f32 %v415_v25, %v413_v23  ;;  %v543_v6 = vmul.f32 %v435_v26, %v435_v26 }
  0xad   : > { %v566_v44 = vadd.f32 %v535_v39, %v534_v40 }
  0xb1   : > { %v1025_v31 = vpop.f32.mrf.mxu2  ;;  %v1031_v38 = vpop.f32.mrf.mxu3 }
  0xb2   : > { %v418_v27 = vpop.f32.mrf.mxu0  ;;  %v438_v29 = vpop.f32.mrf.mxu1 }
  0xb3   : > { %v536_v42 = vmul.f32 %v418_v27, %v418_v27  ;;  %v495_v45 = vadd.f32 %v494_v41, %v418_v27  ;;  %v544_v10 = vmul.f32 %v438_v29, %v438_v29 }
  0xb5   : > { %v567_v48 = vadd.f32 %v566_v44, %v536_v42 }
  0xb9   : > { %v1029_v35 = vpop.f32.mrf.mxu2  ;;  %v1035_v55 = vpop.f32.mrf.mxu3 }
  0xba   : > { %v420_v30 = vpop.f32.mrf.mxu0  ;;  %v440_v32 = vpop.f32.mrf.mxu1  ;;  %v552_v44 = vmul.f32 %v1029_v35, %v1029_v35 }
  0xbb   : > { %v537_v46 = vmul.f32 %v420_v30, %v420_v30  ;;  %v496_v49 = vadd.f32 %v495_v45, %v420_v30  ;;  %v545_v13 = vmul.f32 %v440_v32, %v440_v32 }
  0xbd   : > { %v568_v52 = vadd.f32 %v567_v48, %v537_v46 }
  0xc1   : > { %v1033_v43 = vpop.f32.mrf.mxu2  ;;  %v480_v9 = vpop.f32.mrf.mxu3 }
  0xc2   : > { %v423_v33 = vpop.f32.mrf.mxu0  ;;  %v443_v37 = vpop.f32.mrf.mxu1 }
  0xc3   : > { %v538_v50 = vmul.f32 %v423_v33, %v423_v33  ;;  %v497_v53 = vadd.f32 %v496_v49, %v423_v33  ;;  %v546_v17 = vmul.f32 %v443_v37, %v443_v37 }
  0xc5   : > { %v569_v56 = vadd.f32 %v568_v52, %v538_v50 }
  0xc9   : > { %v463_v62 = vpop.f32.mrf.mxu2 }
  0xca   : > { %v425_v36 = vpop.f32.mrf.mxu0  ;;  %v445_v51 = vpop.f32.mrf.mxu1  ;;  %v554_v50 = vmul.f32 %v463_v62, %v463_v62 }
  0xcb   : > { %v539_v54 = vmul.f32 %v425_v36, %v425_v36  ;;  %v498_v57 = vadd.f32 %v497_v53, %v425_v36  ;;  %v547_v20 = vmul.f32 %v445_v51, %v445_v51 }
  0xcd   : > { %v570_v59 = vadd.f32 %v569_v56, %v539_v54 }
  0xd1   : > { %v465_v16 = vpop.f32.mrf.mxu2 }
  0xd2   : > { %v428_v47 = vpop.f32.mrf.mxu0  ;;  %v448_v5 = vpop.f32.mrf.mxu1  ;;  %v555_v54 = vmul.f32 %v465_v16, %v465_v16 }
  0xd3   : > { %v540_v58 = vmul.f32 %v428_v47, %v428_v47  ;;  %v499_v60 = vadd.f32 %v498_v57, %v428_v47  ;;  %v548_v25 = vmul.f32 %v448_v5, %v448_v5  ;;  %v553_v47 = vmul.f32 %v1033_v43, %v1033_v43 }
  0xd5   : > { %v571_v63 = vadd.f32 %v570_v59, %v540_v58 }
  0xd9   : > { %v468_v40 = vpop.f32.mrf.mxu2 }
  0xda   : > { %v430_v61 = vpop.f32.mrf.mxu0  ;;  %v450_v23 = vpop.f32.mrf.mxu1  ;;  %v556_v59 = vmul.f32 %v468_v40, %v468_v40 }
  0xdb   : > { %v500_v0 = vadd.f32 %v499_v60, %v430_v61  ;;  %v541_v1 = vmul.f32 %v430_v61, %v430_v61  ;;  %v549_v36 = vmul.f32 %v450_v23, %v450_v23 }
  0xdd   : > { %v501_v3 = vadd.f32 %v500_v0, %v433_v24  ;;  %v572_v4 = vadd.f32 %v571_v63, %v541_v1  ;;  %v558_v63 = vmul.f32 %v1027_v34, %v1027_v34 }
  0xdf   : > { %v502_v7 = vadd.f32 %v501_v3, %v435_v26  ;;  %v573_v8 = vadd.f32 %v572_v4, %v542_v2  ;;  %v483_v26 = vpop.f32.mrf.mxu3  ;;  %v560_v4 = vmul.f32 %v1035_v55, %v1035_v55 }
  0xe1   : > { %v503_v11 = vadd.f32 %v502_v7, %v438_v29  ;;  %v574_v12 = vadd.f32 %v573_v8, %v543_v6  ;;  %v550_v29 = vmul.f32 %v1023_v28, %v1023_v28  ;;  %v470_v56 = vpop.f32.mrf.mxu2  ;;  %v561_v7 = vmul.f32 %v480_v9, %v480_v9 }
  0xe2   : > { %v557_v61 = vmul.f32 %v470_v56, %v470_v56 }
  0xe3   : > { %v575_v14 = vadd.f32 %v574_v12, %v544_v10  ;;  %v504_v15 = vadd.f32 %v503_v11, %v440_v32  ;;  %v562_v11 = vmul.f32 %v483_v26, %v483_v26 }
  0xe5   : > { %v505_v18 = vadd.f32 %v504_v15, %v443_v37  ;;  %v576_v19 = vadd.f32 %v575_v14, %v545_v13  ;;  %v551_v37 = vmul.f32 %v1025_v31, %v1025_v31 }
  0xe7   : > { %v506_v21 = vadd.f32 %v505_v18, %v445_v51  ;;  %v577_v22 = vadd.f32 %v576_v19, %v546_v17  ;;  %v485_v49 = vpop.f32.mrf.mxu3 }
  0xe8   : > { %v563_v14 = vmul.f32 %v485_v49, %v485_v49 }
  0xe9   : > { %v507_v24 = vadd.f32 %v506_v21, %v448_v5  ;;  %v578_v27 = vadd.f32 %v577_v22, %v547_v20 }
  0xeb   : > { %v579_v30 = vadd.f32 %v578_v27, %v548_v25  ;;  %v508_v33 = vadd.f32 %v507_v24, %v450_v23 }
  0xed   : > { %v509_v32 = vadd.f32 %v508_v33, %v1023_v28  ;;  %v580_v39 = vadd.f32 %v579_v30, %v549_v36  ;;  %v493_v36 = vld [vmem:[#allocation2] sm:$0x1] }
  0xef   : > { %v510_v41 = vadd.f32 %v509_v32, %v1025_v31  ;;  %v581_v42 = vadd.f32 %v580_v39, %v550_v29  ;;  %v488_v1 = vpop.f32.mrf.mxu3  ;;  %v533_v39 = vld [vmem:[#allocation3] sm:$0x1] }
  0xf1   : > { %v511_v45 = vadd.f32 %v510_v41, %v1029_v35  ;;  %v582_v46 = vadd.f32 %v581_v42, %v551_v37 }
  0xf3   : > { %v583_v48 = vadd.f32 %v582_v46, %v552_v44  ;;  %v512_v28 = vadd.f32 %v511_v45, %v1033_v43 }
  0xf5   : > { %v513_v51 = vadd.f32 %v512_v28, %v463_v62  ;;  %v584_v52 = vadd.f32 %v583_v48, %v553_v47  ;;  %v559_v62 = vmul.f32 %v1031_v38, %v1031_v38 }
  0xf7   : > { %v514_v53 = vadd.f32 %v513_v51, %v465_v16  ;;  %v585_v31 = vadd.f32 %v584_v52, %v554_v50  ;;  %v490_v16 = vpop.f32.mrf.mxu3 }
  0xf8   : > { %v565_v21 = vmul.f32 %v490_v16, %v490_v16 }
  0xf9   : > { %v586_v57 = vadd.f32 %v585_v31, %v555_v54  ;;  %v515_v58 = vadd.f32 %v514_v53, %v468_v40 }
  0xfb   : > { %v587_v60 = vadd.f32 %v586_v57, %v556_v59  ;;  %v516_v35 = vadd.f32 %v515_v58, %v470_v56 }
  0xfd   : > { %v517_v0 = vadd.f32 %v516_v35, %v1027_v34  ;;  %v588_v43 = vadd.f32 %v587_v60, %v557_v61 }
  0xff   : > { %v518_v2 = vadd.f32 %v517_v0, %v1031_v38  ;;  %v589_v3 = vadd.f32 %v588_v43, %v558_v63  ;;  %v564_v38 = vmul.f32 %v488_v1, %v488_v1 }
 0x101   : > { %v519_v5 = vadd.f32 %v518_v2, %v1035_v55  ;;  %v590_v6 = vadd.f32 %v589_v3, %v559_v62 }
 0x103   : > { %v591_v8 = vadd.f32 %v590_v6, %v560_v4  ;;  %v520_v10 = vadd.f32 %v519_v5, %v480_v9 }
 0x105   : > { %v521_v12 = vadd.f32 %v520_v10, %v483_v26  ;;  %v592_v34 = vadd.f32 %v591_v8, %v561_v7 }
 0x107   : > { %v522_v13 = vadd.f32 %v521_v12, %v485_v49  ;;  %v593_v15 = vadd.f32 %v592_v34, %v562_v11 }
 0x109   : > { %v594_v17 = vadd.f32 %v593_v15, %v563_v14  ;;  %v523_v18 = vadd.f32 %v522_v13, %v488_v1 }
 0x10b   : > { %v595_v19 = vadd.f32 %v594_v17, %v564_v38  ;;  %v524_v20 = vadd.f32 %v523_v18, %v490_v16 }
 0x10d   : > { %v525_v22 = vrot.slane %v524_v20, 4  ;;  %v596_v23 = vadd.f32 %v595_v19, %v565_v21 }
 0x10f   : > { %v526_v55 = vadd.f32 %v525_v22, %v524_v20  ;;  %v597_v24 = vrot.slane %v596_v23, 4 }
 0x111   : > { %v527_v25 = vrot.slane %v526_v55, 2  ;;  %v598_v27 = vadd.f32 %v597_v24, %v596_v23 }
 0x113   : > { %v528_v9 = vadd.f32 %v527_v25, %v526_v55  ;;  %v599_v30 = vrot.slane %v598_v27, 2 }
 0x115   : > { %v529_v26 = vrot.slane %v528_v9, 1  ;;  %v600_v33 = vadd.f32 %v599_v30, %v598_v27 }
 0x117   : > { %v530_v29 = vadd.f32 %v529_v26, %v528_v9  ;;  %v601_v32 = vrot.slane %v600_v33, 1 }
 0x119   : > { %v531_v40 = vadd.f32 %v530_v29, %v493_v36  ;;  %v602_v37 = vadd.f32 %v601_v32, %v600_v33  ;;  %608 = sbr.rel (%p801_p5) target bundleno = 326 (0x146), region = 44 }
 0x11b   : > { %532 = vst [vmem:[#allocation2] sm:$0x1] %v531_v40  ;;  %v603_v41 = vadd.f32 %v602_v37, %v533_v39 }
 0x11d   : > { %604 = vst [vmem:[#allocation3] sm:$0x1] %v603_v41 }
 0x11e   : > { %v627_v56 = vld [vmem:[%s1089_s2] sm:$0x1] }
 0x11f   : > { %v630_v59 = vld [vmem:[%s1090_s3] sm:$0x1] }
 0x122   : > { %v609_v42 = vld [vmem:[#allocation2] sm:$0x1] }
 0x123   : > { %v610_v45 = vmul.f32 0.001953125, %v609_v42 }
 0x124   : > { %v611_v44 = vld [vmem:[#allocation3] sm:$0x1] }
 0x125   : > { %v612_v46 = vmul.f32 0.001953125, %v611_v44  ;;  %v613_v47 = vmul.f32 %v610_v45, %v610_v45 }
 0x127   : > { %v614_v48 = vsub.f32 %v612_v46, %v613_v47 }
 0x129   : > { %v615_v28 = vmax.f32 %v614_v48, 0.0 }
 0x12b   : > { %v616_v49 = vadd.f32 1e-05, %v615_v28 }
 0x12d   : > { %858 = vrsqrt.f32 %v616_v49  ;;  %vm623_vm2 = vweird.f32 %v616_v49 }
 0x133   : > { %v859_v50 = vpop.eup %858 }
 0x134   : > { %v618_v51 = vmul.f32 %v859_v50, %v616_v49  ;;  %vm624_vm3 = vweird.f32 %v859_v50 }
 0x135   : > { %vm625_vm4 = vmor %vm623_vm2, %vm624_vm3 }
 0x136   : > { %v619_v52 = vmul.f32 %v859_v50, %v618_v51 }
 0x138   : > { %v620_v53 = vmul.f32 0.5, %v619_v52 }
 0x13a   : > { %v621_v54 = vsub.f32 1.5, %v620_v53 }
 0x13c   : > { %v622_v31 = vmul.f32 %v859_v50, %v621_v54 }
 0x13e   : > { %v626_v57 = vsel %vm625_vm4, %v859_v50, %v622_v31 }
 0x13f   : > { %v628_v58 = vmul.f32 %v627_v56, %v626_v57 }
 0x141   : > { %629 = vst [vmem:[#allocation4] sm:$0x1] %v628_v58  ;;  %v631_v60 = vmul.f32 %v628_v58, %v610_v45 }
 0x143   : > { %v632_v35 = vsub.f32 %v630_v59, %v631_v60 }
 0x145   : > { %633 = vst [vmem:[#allocation6] sm:$0x1] %v632_v35 }
 0x146 PF: > { %p843_p6 = scmp.eq.s32.totalorder %s971_s19, 1  ;;  %s933_s10 = smov [#allocation4]  }
 0x147   : > { %s640_s11 = sshll.u32 %s933_s10, 4  ;;  %s642_s14 = sshll.u32 %s1091_s4, 4  ;;  %s641_s11 = int_to_ptr.vmem [resolvable:$true] %s640_s11  ;;  %s643_s14 = int_to_ptr.hbm [resolvable:$true] %s642_s14 }
 0x148   : > { %836 = dma.vmem_to_hbm [thread:$0]  (%p843_p6), %s641_s11, 16, %s643_s14, [#allocation5]  }
 0x149   : > { %s654_s17 = sshll.u32 %s1092_s5, 4  ;;  %s934_s20 = smov [#allocation6]   ;;  %s655_s17 = int_to_ptr.hbm [resolvable:$true] %s654_s17 }
 0x14a   : > { %s652_s21 = sshll.u32 %s934_s20, 4  ;;  %s653_s21 = int_to_ptr.vmem [resolvable:$true] %s652_s21 }
 0x14b   : > { %838 = dma.vmem_to_hbm [thread:$0]  (%p843_p6), %s653_s21, 16, %s655_s17, [#allocation7]  }
 0x14c   : > { %921 = dma.done.wait (%p843_p6), [#allocation5], 16  }
 0x14d   : > { %923 = vsyncadd (%p843_p6), [#allocation5], 4294967280 }
 0x14e   : > { %925 = dma.done.wait (%p843_p6), [#allocation7], 16  }
 0x14f   : > { %927 = vsyncadd (%p843_p6), [#allocation7], 4294967280 }
 0x150 PF: > { %s18_s18 = sadd.s32 1, %s930_s18  }
 0x151   : > { %p15_p7 = scmp.ge.s32.totalorder %s18_s18, 4  }
 0x153   :  { %17 = sbr.rel (!%p15_p7) target bundleno = 2 (0x2), region = 79 }
 0x158   :  { %673 = vsyncpa [#allocation5], 1 }
 0x159   :  { %675 = vsyncpa [#allocation5 + $0x1], 1 }
 0x15a   :  { %676 = vsyncpa [#allocation7], 1 }

</bundles_post_ra>
